<compile_context>
chip_gen: v7x
topology: tpu7x:2x2x1
jax: 0.10.0
libtpu: 0.0.40
codegen_flags: <defaults>
</compile_context>

<pallas_src>
import functools

import jax
import jax.numpy as jnp
from jax.experimental import pallas as pl
from jax.experimental.pallas import tpu as pltpu


# ----------------------------------------------------------------------------
# Pallas kernel: Y = [relu]( (X @ W) * scale + bias [+ residual] )
# Tiled over (M, N, K); f32 accumulator scratch; epilogue on last K step.
# ----------------------------------------------------------------------------
def _fused_mm_kernel(x_ref, w_ref, scale_ref, bias_ref, *rest,
                     apply_relu, has_residual):
    if has_residual:
        res_ref, o_ref, acc_ref = rest
    else:
        o_ref, acc_ref = rest

    @pl.when(pl.program_id(2) == 0)
    def _():
        acc_ref[...] = jnp.zeros_like(acc_ref)

    acc_ref[...] += jnp.dot(x_ref[...], w_ref[...],
                            preferred_element_type=jnp.float32)

    @pl.when(pl.program_id(2) == pl.num_programs(2) - 1)
    def _():
        r = acc_ref[...] * scale_ref[...] + bias_ref[...]
        if has_residual:
            r = r + res_ref[...].astype(jnp.float32)
        if apply_relu:
            r = jnp.maximum(r, 0.0)
        o_ref[...] = r.astype(o_ref.dtype)


def _round_up(x, m):
    return ((x + m - 1) // m) * m


def fused_matmul_bn(x2d, w2d, scale, bias, residual=None, apply_relu=True,
                    out_dtype=jnp.bfloat16):
    """One Pallas call: conv-as-matmul + folded BN + (residual) + (ReLU).

    Operands are padded to lane-dense tiles (tn = 128, tk/tm multiples of
    128/8) and fed to the MXU in bf16 with f32 accumulation.
    """
    M, K = x2d.shape
    K2, N = w2d.shape
    assert K == K2

    # --- tile selection (small, generation-safe VMEM footprint) ------------
    tn = 128
    Np = _round_up(N, tn)
    Kp = _round_up(K, 128)
    tk = 128
    for cand in (512, 256, 128):
        if Kp % cand == 0:
            tk = cand
            break
    Mp8 = _round_up(M, 8)
    tm = Mp8 if Mp8 < 256 else 256
    Mp = _round_up(M, tm)

    # --- pad operands (zero-padded K columns contribute nothing) -----------
    x_p = jnp.zeros((Mp, Kp), jnp.bfloat16).at[:M, :K].set(
        x2d.astype(jnp.bfloat16))
    w_p = jnp.zeros((Kp, Np), jnp.bfloat16).at[:K, :N].set(
        w2d.astype(jnp.bfloat16))
    s_p = jnp.zeros((1, Np), jnp.float32).at[0, :N].set(
        scale.astype(jnp.float32))
    b_p = jnp.zeros((1, Np), jnp.float32).at[0, :N].set(
        bias.astype(jnp.float32))

    has_residual = residual is not None
    args = [x_p, w_p, s_p, b_p]
    in_specs = [
        pl.BlockSpec((tm, tk), lambda i, j, k: (i, k)),   # X tile
        pl.BlockSpec((tk, tn), lambda i, j, k: (k, j)),   # W tile (k,j only)
        pl.BlockSpec((1, tn), lambda i, j, k: (0, j)),    # BN scale
        pl.BlockSpec((1, tn), lambda i, j, k: (0, j)),    # BN bias
    ]
    if has_residual:
        r_p = jnp.zeros((Mp, Np), jnp.bfloat16).at[:M, :N].set(
            residual.astype(jnp.bfloat16))
        args.append(r_p)
        in_specs.append(pl.BlockSpec((tm, tn), lambda i, j, k: (i, j)))

    out_itemsize = jnp.dtype(out_dtype).itemsize
    cost = pl.CostEstimate(
        flops=2 * Mp * Np * Kp,
        transcendentals=0,
        bytes_accessed=int(
            Mp * Kp * 2 + Kp * Np * 2 + Mp * Np * out_itemsize
            + (Mp * Np * 2 if has_residual else 0)),
    )

    kern = functools.partial(_fused_mm_kernel,
                             apply_relu=apply_relu,
                             has_residual=has_residual)

    out = pl.pallas_call(
        kern,
        out_shape=jax.ShapeDtypeStruct((Mp, Np), out_dtype),
        grid_spec=pltpu.PrefetchScalarGridSpec(
            num_scalar_prefetch=0,
            grid=(Mp // tm, Np // tn, Kp // tk),
            in_specs=in_specs,
            out_specs=pl.BlockSpec((tm, tn), lambda i, j, k: (i, j)),
            scratch_shapes=[pltpu.VMEM((tm, tn), jnp.float32)]),
        compiler_params=pltpu.CompilerParams(
            dimension_semantics=("parallel", "parallel", "arbitrary")),
        cost_estimate=cost,
    )(*args)

    return out[:M, :N]


# ----------------------------------------------------------------------------
# Glue: BN folding, im2col, parameter init, forward
# ----------------------------------------------------------------------------
def bn_fold(gamma, beta, mean, var, eps=1e-5):
    scale = gamma / jnp.sqrt(var + eps)
    bias = beta - mean * scale
    return scale, bias


def im2col_3x3(x_nhwc, stride):
    """3x3, pad=1, given stride. Returns (N*Hout*Wout, 9*C) with K ordered
    as (ky*3 + kx)*C + cin, matching the reshaped OIHW weight. Keeps the
    input dtype (bf16 intermediates -> bf16 patches)."""
    n, h, w, c = x_nhwc.shape
    xp = jnp.pad(x_nhwc, ((0, 0), (1, 1), (1, 1), (0, 0)))
    hout = (h + 2 - 3) // stride + 1
    wout = (w + 2 - 3) // stride + 1
    cols = []
    for ky in range(3):
        for kx in range(3):
            cols.append(xp[:, ky: ky + stride * (hout - 1) + 1: stride,
                              kx: kx + stride * (wout - 1) + 1: stride, :])
    patches = jnp.concatenate(cols, axis=-1)          # (n, hout, wout, 9*c)
    return patches.reshape(n * hout * wout, 9 * c), hout, wout


EXPANSION = 4


def init_bottleneck_params(key, in_planes, planes, stride=1, wide=1):
    mid = planes * wide
    out = EXPANSION * planes
    ks = jax.random.split(key, 8)

    def conv_w(k, cout, cin, kh, kw):
        fan = cin * kh * kw
        return jax.random.normal(k, (cout, cin, kh, kw), jnp.float32) * (2.0 / fan) ** 0.5

    def bn_p(k, c):
        k1, k2, k3, k4 = jax.random.split(k, 4)
        gamma = 1.0 + 0.1 * jax.random.normal(k1, (c,), jnp.float32)
        beta = 0.1 * jax.random.normal(k2, (c,), jnp.float32)
        mean = 0.1 * jax.random.normal(k3, (c,), jnp.float32)
        var = jnp.abs(jax.random.normal(k4, (c,), jnp.float32)) * 0.5 + 0.5
        return (gamma, beta, mean, var)

    params = dict(
        conv1=conv_w(ks[0], mid, in_planes, 1, 1), bn1=bn_p(ks[1], mid),
        conv2=conv_w(ks[2], mid, mid, 3, 3),       bn2=bn_p(ks[3], mid),
        conv3=conv_w(ks[4], out, mid, 1, 1),       bn3=bn_p(ks[5], out),
    )
    if stride != 1 or in_planes != out:
        params["convs"] = conv_w(ks[6], out, in_planes, 1, 1)
        params["bns"] = bn_p(ks[7], out)
    return params


def bottleneck_forward(params, x_nchw, stride=1):
    n, c, h, w = x_nchw.shape
    x = jnp.transpose(x_nchw, (0, 2, 3, 1)).astype(jnp.float32)   # NHWC

    # conv1 (1x1) + bn1 + relu   (bf16 intermediate)
    w1 = params["conv1"][:, :, 0, 0].T                            # (Cin, mid)
    s1, b1 = bn_fold(*params["bn1"])
    mid = w1.shape[1]
    out1 = fused_matmul_bn(x.reshape(n * h * w, c), w1, s1, b1,
                           apply_relu=True, out_dtype=jnp.bfloat16)
    out1 = out1.reshape(n, h, w, mid)

    # conv2 (3x3, stride, pad=1) + bn2 + relu (bf16 im2col + fused matmul)
    patches, hout, wout = im2col_3x3(out1, stride)
    w2 = jnp.transpose(params["conv2"], (2, 3, 1, 0)).reshape(9 * mid, mid)
    s2, b2 = bn_fold(*params["bn2"])
    out2 = fused_matmul_bn(patches, w2, s2, b2,
                           apply_relu=True, out_dtype=jnp.bfloat16)

    # shortcut path
    out_ch = params["conv3"].shape[0]
    if "convs" in params:
        xs = x[:, ::stride, ::stride, :]            # 1x1 stride-s conv sampling
        ws = params["convs"][:, :, 0, 0].T
        ss, bs = bn_fold(*params["bns"])
        short = fused_matmul_bn(xs.reshape(n * hout * wout, c), ws, ss, bs,
                                apply_relu=False, out_dtype=jnp.bfloat16)
    else:
        short = x.reshape(n * hout * wout, c)       # identity

    # conv3 (1x1) + bn3 + residual add + relu  (all fused in one kernel, f32 out)
    w3 = params["conv3"][:, :, 0, 0].T
    s3, b3 = bn_fold(*params["bn3"])
    out = fused_matmul_bn(out2, w3, s3, b3, residual=short,
                          apply_relu=True, out_dtype=jnp.float32)
    out = out.reshape(n, hout, wout, out_ch)
    return jnp.transpose(out, (0, 3, 1, 2))         # back to NCHW


# ----------------------------------------------------------------------------
# Pure-JAX reference (independent: uses lax.conv_general_dilated, f32)
# ----------------------------------------------------------------------------
def ref_forward(params, x_nchw, stride=1):
    def conv(x, w, s=1, padding="VALID"):
        return jax.lax.conv_general_dilated(
            x, w, (s, s), padding, dimension_numbers=("NCHW", "OIHW", "NCHW"))

    def bn(x, p):
        gamma, beta, mean, var = p
        sc = gamma / jnp.sqrt(var + 1e-5)
        bi = beta - mean * sc
        return x * sc[None, :, None, None] + bi[None, :, None, None]

    out = jax.nn.relu(bn(conv(x_nchw, params["conv1"]), params["bn1"]))
    out = jax.nn.relu(bn(conv(out, params["conv2"], stride, ((1, 1), (1, 1))),
                         params["bn2"]))
    out = bn(conv(out, params["conv3"]), params["bn3"])
    if "convs" in params:
        sc = bn(conv(x_nchw, params["convs"], stride), params["bns"])
    else:
        sc = x_nchw
    return jax.nn.relu(out + sc)


if __name__ == "__main__":
    key = jax.random.PRNGKey(0)
    k_x, k_p = jax.random.split(key)

    # small, module-consistent shapes: batch=2, in_planes=8, planes=8,
    # stride=2, wide=1  ->  output channels = 4*8 = 32, spatial 8 -> 4
    batch, in_planes, planes, stride, wide, hw = 2, 8, 8, 2, 1, 8
    x = jax.random.normal(k_x, (batch, in_planes, hw, hw), jnp.float32)  # NCHW

    params = init_bottleneck_params(k_p, in_planes, planes, stride, wide)

    out = jax.block_until_ready(bottleneck_forward(params, x, stride=stride))
    ref = jax.block_until_ready(ref_forward(params, x, stride=stride))

    assert out.shape == (batch, EXPANSION * planes, hw // stride, hw // stride)
    # bf16 MXU operands + bf16 intermediates -> use a bf16-appropriate tolerance
    max_err = float(jnp.max(jnp.abs(out - ref)))
    assert jnp.allclose(out, ref, rtol=3e-2, atol=3e-2), max_err

    print("KERNEL_OK")
</pallas_src>

<mosaic_0001>
module attributes {stable_mosaic.version = 11 : i64} {
  func.func @_fused_mm_kernel(%arg0: i32, %arg1: i32, %arg2: i32, %arg3: memref<128x128xbf16, #tpu.memory_space<vmem>>, %arg4: memref<128x128xbf16, #tpu.memory_space<vmem>>, %arg5: memref<1x128xf32, #tpu.memory_space<vmem>>, %arg6: memref<1x128xf32, #tpu.memory_space<vmem>>, %arg7: memref<128x128xbf16, #tpu.memory_space<vmem>>, %arg8: memref<128x128xf32, #tpu.memory_space<vmem>>) attributes {dimension_semantics = [#tpu.dimension_semantics<parallel>, #tpu.dimension_semantics<parallel>, #tpu.dimension_semantics<arbitrary>], iteration_bounds = array<i64: 1, 1, 1>, scalar_prefetch = 0 : i64, scratch_operands = 1 : i64, tpu.core_type = #tpu.core_type<tc>, window_params = [{transform_indices = @transform_0, window_bounds = array<i64: 128, 128>}, {transform_indices = @transform_1, window_bounds = array<i64: 128, 128>}, {transform_indices = @transform_2, window_bounds = array<i64: 1, 128>}, {transform_indices = @transform_3, window_bounds = array<i64: 1, 128>}, {transform_indices = @transform_4, window_bounds = array<i64: 128, 128>}]} {
    %c0_i32 = arith.constant 0 : i32
    %0 = arith.cmpi eq, %arg2, %c0_i32 : i32
    %1 = arith.extui %0 : i1 to i32
    %c0_i32_0 = arith.constant 0 : i32
    %2 = arith.cmpi ne, %1, %c0_i32_0 : i32
    scf.if %2 {
      %cst_10 = arith.constant 0.000000e+00 : f32
      %12 = vector.broadcast %cst_10 : f32 to vector<128x128xf32>
      %c0_11 = arith.constant 0 : index
      %c0_12 = arith.constant 0 : index
      %13 = vector.load %arg8[%c0_11, %c0_12] : memref<128x128xf32, #tpu.memory_space<vmem>>, vector<128x128xf32>
      tpu.vector_store %arg8[%c0_11, %c0_12], %12 {strides = array<i32>} : memref<128x128xf32, #tpu.memory_space<vmem>>, vector<128x128xf32>,
    } else {
    }
    %c0 = arith.constant 0 : index
    %c0_1 = arith.constant 0 : index
    %3 = vector.load %arg8[%c0, %c0_1] : memref<128x128xf32, #tpu.memory_space<vmem>>, vector<128x128xf32>
    %c0_2 = arith.constant 0 : index
    %c0_3 = arith.constant 0 : index
    %4 = vector.load %arg3[%c0_2, %c0_3] : memref<128x128xbf16, #tpu.memory_space<vmem>>, vector<128x128xbf16>
    %c0_4 = arith.constant 0 : index
    %c0_5 = arith.constant 0 : index
    %5 = vector.load %arg4[%c0_4, %c0_5] : memref<128x128xbf16, #tpu.memory_space<vmem>>, vector<128x128xbf16>
    %cst = arith.constant dense<0.000000e+00> : vector<128x128xf32>
    %6 = tpu.matmul %4, %5, %cst {dimension_numbers = #tpu.dot_dimension_numbers<[1], [0], [0], [1], [0, 0, 1, 1], [], []>} : vector<128x128xbf16>, vector<128x128xbf16>, vector<128x128xf32> -> vector<128x128xf32>
    %7 = arith.addf %3, %6 : vector<128x128xf32>
    %c0_6 = arith.constant 0 : index
    %c0_7 = arith.constant 0 : index
    %8 = vector.load %arg8[%c0_6, %c0_7] : memref<128x128xf32, #tpu.memory_space<vmem>>, vector<128x128xf32>
    tpu.vector_store %arg8[%c0_6, %c0_7], %7 {strides = array<i32>} : memref<128x128xf32, #tpu.memory_space<vmem>>, vector<128x128xf32>,
    %c0_i32_8 = arith.constant 0 : i32
    %9 = arith.cmpi eq, %arg2, %c0_i32_8 : i32
    %10 = arith.extui %9 : i1 to i32
    %c0_i32_9 = arith.constant 0 : i32
    %11 = arith.cmpi ne, %10, %c0_i32_9 : i32
    scf.if %11 {
      %c0_10 = arith.constant 0 : index
      %c0_11 = arith.constant 0 : index
      %12 = vector.load %arg8[%c0_10, %c0_11] : memref<128x128xf32, #tpu.memory_space<vmem>>, vector<128x128xf32>
      %c0_12 = arith.constant 0 : index
      %c0_13 = arith.constant 0 : index
      %13 = vector.load %arg5[%c0_12, %c0_13] : memref<1x128xf32, #tpu.memory_space<vmem>>, vector<1x128xf32>
      %14 = vector.broadcast %13 : vector<1x128xf32> to vector<128x128xf32>
      %15 = arith.mulf %12, %14 : vector<128x128xf32>
      %c0_14 = arith.constant 0 : index
      %c0_15 = arith.constant 0 : index
      %16 = vector.load %arg6[%c0_14, %c0_15] : memref<1x128xf32, #tpu.memory_space<vmem>>, vector<1x128xf32>
      %17 = vector.broadcast %16 : vector<1x128xf32> to vector<128x128xf32>
      %18 = arith.addf %15, %17 : vector<128x128xf32>
      %cst_16 = arith.constant 0.000000e+00 : f32
      %19 = vector.broadcast %cst_16 : f32 to vector<128x128xf32>
      %20 = arith.maximumf %18, %19 : vector<128x128xf32>
      %21 = arith.truncf %20 : vector<128x128xf32> to vector<128x128xbf16>
      %c0_17 = arith.constant 0 : index
      %c0_18 = arith.constant 0 : index
      %22 = vector.load %arg7[%c0_17, %c0_18] : memref<128x128xbf16, #tpu.memory_space<vmem>>, vector<128x128xbf16>
      tpu.vector_store %arg7[%c0_17, %c0_18], %21 {strides = array<i32>} : memref<128x128xbf16, #tpu.memory_space<vmem>>, vector<128x128xbf16>,
    } else {
    }
    return
  }
  func.func @transform_0(%arg0: i32, %arg1: i32, %arg2: i32) -> (i32, i32) {
    %c0_i32 = arith.constant 0 : i32
    return %arg0, %arg2 : i32, i32
  }
  func.func @transform_1(%arg0: i32, %arg1: i32, %arg2: i32) -> (i32, i32) {
    %c0_i32 = arith.constant 0 : i32
    return %arg2, %arg1 : i32, i32
  }
  func.func @transform_2(%arg0: i32, %arg1: i32, %arg2: i32) -> (i32, i32) {
    %c0_i32 = arith.constant 0 : i32
    %c0_i32_0 = arith.constant 0 : i32
    return %c0_i32, %arg1 : i32, i32
  }
  func.func @transform_3(%arg0: i32, %arg1: i32, %arg2: i32) -> (i32, i32) {
    %c0_i32 = arith.constant 0 : i32
    %c0_i32_0 = arith.constant 0 : i32
    return %c0_i32, %arg1 : i32, i32
  }
  func.func @transform_4(%arg0: i32, %arg1: i32, %arg2: i32) -> (i32, i32) {
    %c0_i32 = arith.constant 0 : i32
    return %arg0, %arg1 : i32, i32
  }
}

</mosaic_0001>

<bundles_post_ra>
// kernel: tpu_custom_call.1
= control target key start
LH: loop header
LB: loop body
LE: loop exit
PB: predicated region body
PF: predicated region fallthrough
CT: control target
= control target key end

     0   :  { %9 = vsyncpa [#allocation4], 0  ;;  %s872_s0 = inlined_call_operand.hbm [shape: bf16[128,128], index: 0, kind: input, shape index: {}]   ;;  %s873_s1 = inlined_call_operand.hbm [shape: bf16[128,128], index: 1, kind: input, shape index: {}]   ;;  %s874_s2 = inlined_call_operand.vmem [shape: f32[1,128], index: 2, kind: input, shape index: {}]   ;;  %s875_s3 = inlined_call_operand.vmem [shape: f32[1,128], index: 3, kind: input, shape index: {}]   ;;  %s876_s4 = inlined_call_operand.hbm [shape: bf16[128,128], index: 4, kind: output, shape index: {}]  }
   0x1   :  { %10 = vsyncpa [#allocation7], 0 }
   0x2   :  { %11 = vsyncpa [#allocation5], 0  ;;  %s773_s15 = smov [#allocation3]   ;;  %s701_s19 = scalar_lea.hbm %s872_s0, 1024 }
   0x3   :  { %s17_s16 = sshll.u32 %s773_s15, 4  ;;  %p702_p0 = scmp.ne.s32.totalorder %s872_s0, %s701_s19  ;;  %s18_s16 = int_to_ptr.vmem [resolvable:$true] %s17_s16 }
   0x4   :  { %p705_p1 = scmp.lt.u32.totalorder %s701_s19, %s872_s0 }
   0x6   :  { %p707_p2 = pnand %p705_p1, %p702_p0 }
   0x8   :  { %710 = shalt.err (!%p707_p2)
}
   0x9   :  { %s711_s24 = scalar_lea.vmem %s18_s16, 1024  ;;  %p716_p4 = scmp.lt.s32.totalorder %s18_s16, %s18_s16 }
   0xa   :  { %p712_p3 = scmp.ne.s32.totalorder %s18_s16, %s711_s24  ;;  %p717_p5 = scmp.lt.s32.totalorder %s711_s24, %s711_s24 }
   0xc   :  { %p718_p6 = por %p717_p5, %p716_p4 }
   0xe   :  { %p719_p7 = pnand %p718_p6, %p712_p3 }
  0x10   :  { %722 = shalt.err (!%p719_p7)
}
  0x11   :  { %s774_s25 = smov 64   ;;  %s775_s26 = smov 4  }
  0x12   :  { %23 = dma.hbm_to_vmem [thread:$0]  %s872_s0, 1024, %s18_s16, [#allocation4], %s774_s25, %s774_s25, %s775_s26  }
  0x13   :  { %s776_s29 = smov [#allocation6]   ;;  %s723_s7 = scalar_lea.hbm %s873_s1, 1024 }
  0x14   :  { %s29_s30 = sshll.u32 %s776_s29, 4  ;;  %p724_p8 = scmp.ne.s32.totalorder %s873_s1, %s723_s7  ;;  %s30_s30 = int_to_ptr.vmem [resolvable:$true] %s29_s30 }
  0x15   :  { %p727_p9 = scmp.lt.u32.totalorder %s723_s7, %s873_s1 }
  0x17   :  { %p729_p10 = pnand %p727_p9, %p724_p8 }
  0x19   :  { %732 = shalt.err (!%p729_p10)
}
  0x1a   :  { %s733_s12 = scalar_lea.vmem %s30_s30, 1024  ;;  %p738_p12 = scmp.lt.s32.totalorder %s30_s30, %s30_s30 }
  0x1b   :  { %p734_p11 = scmp.ne.s32.totalorder %s30_s30, %s733_s12  ;;  %p739_p13 = scmp.lt.s32.totalorder %s733_s12, %s733_s12 }
  0x1d   :  { %p740_p0 = por %p739_p13, %p738_p12 }
  0x1f   :  { %p741_p1 = pnand %p740_p0, %p734_p11 }
  0x21   :  { %744 = shalt.err (!%p741_p1)
}
  0x22   :  { %35 = dma.hbm_to_vmem [thread:$0]  %s873_s1, 1024, %s30_s30, [#allocation7], %s774_s25, %s774_s25, %s775_s26  }
  0x23   :  { %767 = dma.done.wait [#allocation4], 1024  }
  0x24   :  { %768 = vsyncadd [#allocation4], 4294966272 }
  0x25   :  { %769 = dma.done.wait [#allocation7], 1024  }
  0x26   :  { %770 = vsyncadd [#allocation7], 4294966272  ;;  %v685_v0 = vld [vmem:[#allocation6] sm:$0xff]   ;;  %v686_v1 = vld [vmem:[#allocation6 + $0x8] sm:$0xff]  }
  0x27   :  { %632 = vmatprep.subr.bf16.mxu0 %v685_v0  ;;  %664 = vmatprep.subr.bf16.mxu1 %v685_v0  ;;  %v687_v2 = vld [vmem:[#allocation6 + $0x10] sm:$0xff]   ;;  %v688_v3 = vld [vmem:[#allocation6 + $0x18] sm:$0xff]   ;;  %v693_v4 = vld [vmem:[#allocation3] sm:$0xff]  }
  0x28   :  { %633 = vmatpush3.bf16.msra.mxu0 %v685_v0  ;;  %672 = vmatpush3.bf16.msra.mxu1 %v685_v0  ;;  %v694_v5 = vld [vmem:[#allocation3 + $0x20] sm:$0xff]   ;;  %v690_v7 = vld [vmem:[#allocation6 + $0x28] sm:$0xff]   ;;  %v691_v8 = vld [vmem:[#allocation6 + $0x30] sm:$0xff]  }
  0x29   :  { %634 = vmatprep.subr.bf16.mxu0 %v686_v1  ;;  %665 = vmatprep.subr.bf16.mxu1 %v686_v1  ;;  %v689_v6 = vld [vmem:[#allocation6 + $0x20] sm:$0xff]   ;;  %v692_v9 = vld [vmem:[#allocation6 + $0x38] sm:$0xff]   ;;  %v695_v10 = vld [vmem:[#allocation3 + $0x8] sm:$0xff]  }
  0x2a   :  { %648 = vmatprep.mubr.bf16.mxu0 %v693_v4  ;;  %656 = vmatprep.mubr.bf16.mxu1 %v694_v5  ;;  %v696_v11 = vld [vmem:[#allocation3 + $0x28] sm:$0xff]   ;;  %v697_v12 = vld [vmem:[#allocation3 + $0x10] sm:$0xff]   ;;  %v699_v14 = vld [vmem:[#allocation3 + $0x18] sm:$0xff]  }
  0x2b   :  { %v698_v13 = vld [vmem:[#allocation3 + $0x30] sm:$0xff]   ;;  %v700_v15 = vld [vmem:[#allocation3 + $0x38] sm:$0xff]   ;;  %v535_v16 = vld [vmem:[%s874_s2] ss:$0 sm:$0xff]  ;;  %s777_s2 = smov [#allocation8]  }
  0x2c   :  { %635 = vmatpush3.bf16.msra.mxu0 %v686_v1  ;;  %673 = vmatpush3.bf16.msra.mxu1 %v686_v1  ;;  %v839_v18 = vld [vmem:[%s875_s3] ss:$0 sm:$0xff]  ;;  %s506_s3 = sshll.u32 %s777_s2, 4  ;;  %s507_s3 = int_to_ptr.vmem [resolvable:$true] %s506_s3 }
  0x2d   :  { %636 = vmatprep.subr.bf16.mxu0 %v687_v2  ;;  %666 = vmatprep.subr.bf16.mxu1 %v687_v2  ;;  %s745_s17 = scalar_lea.vmem %s507_s3, 1024  ;;  %p750_p3 = scmp.lt.s32.totalorder %s507_s3, %s507_s3 }
  0x2e   :  { %p746_p2 = scmp.ne.s32.totalorder %s507_s3, %s745_s17  ;;  %p751_p4 = scmp.lt.s32.totalorder %s745_s17, %s745_s17 }
  0x30   :  { %637 = vmatpush3.bf16.msra.mxu0 %v687_v2  ;;  %674 = vmatpush3.bf16.msra.mxu1 %v687_v2  ;;  %p752_p5 = por %p751_p4, %p750_p3 }
  0x31   :  { %638 = vmatprep.subr.bf16.mxu0 %v688_v3  ;;  %667 = vmatprep.subr.bf16.mxu1 %v688_v3 }
  0x32   :  { %p753_p6 = pnand %p752_p5, %p746_p2 }
  0x34   :  { %639 = vmatpush3.bf16.msra.mxu0 %v688_v3  ;;  %675 = vmatpush3.bf16.msra.mxu1 %v688_v3 }
  0x35   :  { %640 = vmatprep.subr.bf16.mxu0 %v689_v6  ;;  %668 = vmatprep.subr.bf16.mxu1 %v689_v6 }
  0x38   :  { %641 = vmatpush3.bf16.msra.mxu0 %v689_v6  ;;  %676 = vmatpush3.bf16.msra.mxu1 %v689_v6 }
  0x39   :  { %642 = vmatprep.subr.bf16.mxu0 %v690_v7  ;;  %669 = vmatprep.subr.bf16.mxu1 %v690_v7 }
  0x3c   :  { %643 = vmatpush3.bf16.msra.mxu0 %v690_v7  ;;  %677 = vmatpush3.bf16.msra.mxu1 %v690_v7 }
  0x3d   :  { %644 = vmatprep.subr.bf16.mxu0 %v691_v8  ;;  %670 = vmatprep.subr.bf16.mxu1 %v691_v8 }
  0x40   :  { %645 = vmatpush3.bf16.msra.mxu0 %v691_v8  ;;  %678 = vmatpush3.bf16.msra.mxu1 %v691_v8 }
  0x41   :  { %646 = vmatprep.subr.bf16.mxu0 %v692_v9  ;;  %671 = vmatprep.subr.bf16.mxu1 %v692_v9 }
  0x44   :  { %647 = vmatpush3.bf16.msra.mxu0 %v692_v9  ;;  %679 = vmatpush3.bf16.msra.mxu1 %v692_v9 }
  0x47   :  { %649 = vmatmul.mubr.bf16.vlgmr.msra.gmra.mrb[0].mxu0 %v695_v10  ;;  %657 = vmatmul.mubr.bf16.vlgmr.msra.gmra.mrb[0].mxu1 %v696_v11 }
  0x48   :  { %652 = vmatprep.mubr.bf16.mxu0 %v697_v12  ;;  %660 = vmatprep.mubr.bf16.mxu1 %v698_v13 }
  0x4f   :  { %653 = vmatmul.mubr.bf16.gmra.mrb[4].mxu0 %v699_v14  ;;  %661 = vmatmul.mubr.bf16.gmra.mrb[4].mxu1 %v700_v15 }
 0x11a   :  { %v650_v17 = vpop.f32.mrb[0].mxu0  ;;  %v658_v19 = vpop.f32.mrb[0].mxu1 }
 0x11b   :  { %v368_v20 = vmul.f32 %v650_v17, %v535_v16  ;;  %v376_v21 = vmul.f32 %v658_v19, %v535_v16  ;;  %v245_v22 = vpop.f32.mrb[1].mxu0  ;;  %v277_v23 = vpop.f32.mrb[1].mxu1 }
 0x11c   :  { %v366_v24 = vmul.f32 %v535_v16, %v245_v22  ;;  %v374_v25 = vmul.f32 %v535_v16, %v277_v23  ;;  %v651_v26 = vpop.f32.mrb[2].mxu0  ;;  %v659_v27 = vpop.f32.mrb[2].mxu1 }
 0x11d   :  { %v391_v28 = vadd.f32 %v839_v18, %v368_v20  ;;  %v399_v29 = vadd.f32 %v839_v18, %v376_v21  ;;  %v369_v30 = vmul.f32 %v651_v26, %v535_v16  ;;  %v377_v31 = vmul.f32 %v659_v27, %v535_v16  ;;  %v248_v32 = vpop.f32.mrb[3].mxu0  ;;  %v280_v33 = vpop.f32.mrb[3].mxu1 }
 0x11e   :  { %v389_v34 = vadd.f32 %v839_v18, %v366_v24  ;;  %v397_v35 = vadd.f32 %v839_v18, %v374_v25  ;;  %v367_v36 = vmul.f32 %v535_v16, %v248_v32  ;;  %v375_v37 = vmul.f32 %v535_v16, %v280_v33 }
 0x11f   :  { %v392_v38 = vadd.f32 %v839_v18, %v369_v30  ;;  %v400_v39 = vadd.f32 %v839_v18, %v377_v31  ;;  %v407_v42 = vmax.f32 %v391_v28, 0.0  ;;  %v415_v43 = vmax.f32 %v399_v29, 0.0 }
 0x120   :  { %v390_v40 = vadd.f32 %v839_v18, %v367_v36  ;;  %v398_v41 = vadd.f32 %v839_v18, %v375_v37  ;;  %v405_v46 = vmax.f32 %v389_v34, 0.0  ;;  %v413_v47 = vmax.f32 %v397_v35, 0.0 }
 0x121   :  { %v408_v44 = vmax.f32 %v392_v38, 0.0  ;;  %v416_v45 = vmax.f32 %v400_v39, 0.0 }
 0x122   :  { %v406_v48 = vmax.f32 %v390_v40, 0.0  ;;  %v414_v49 = vmax.f32 %v398_v41, 0.0  ;;  %v654_v50 = vpop.f32.mrb[4].mxu0  ;;  %v662_v51 = vpop.f32.mrb[4].mxu1 }
 0x123   :  { %v577_v52 = vpack.c.bf16 %v408_v44, %v407_v42  ;;  %v597_v53 = vpack.c.bf16 %v416_v45, %v415_v43  ;;  %v372_v54 = vmul.f32 %v654_v50, %v535_v16  ;;  %v380_v55 = vmul.f32 %v662_v51, %v535_v16  ;;  %v261_v56 = vpop.f32.mrb[5].mxu0  ;;  %v293_v57 = vpop.f32.mrb[5].mxu1 }
 0x124   :  { %v572_v58 = vpack.c.bf16 %v406_v48, %v405_v46  ;;  %v592_v59 = vpack.c.bf16 %v414_v49, %v413_v47  ;;  %v370_v60 = vmul.f32 %v535_v16, %v261_v56  ;;  %v378_v61 = vmul.f32 %v535_v16, %v293_v57  ;;  %v655_v62 = vpop.f32.mrb[6].mxu0  ;;  %v663_v63 = vpop.f32.mrb[6].mxu1 }
 0x125   :  { %609 = vst [vmem:[#allocation8 + $0x8] sm:$0xff] %v577_v52   ;;  %613 = vst [vmem:[#allocation8 + $0x28] sm:$0xff] %v597_v53   ;;  %v395_v0 = vadd.f32 %v839_v18, %v372_v54  ;;  %v403_v1 = vadd.f32 %v839_v18, %v380_v55  ;;  %v373_v2 = vmul.f32 %v655_v62, %v535_v16  ;;  %v264_v4 = vpop.f32.mrb[7].mxu0  ;;  %v296_v5 = vpop.f32.mrb[7].mxu1 }
 0x126   :  { %v381_v3 = vmul.f32 %v663_v63, %v535_v16  ;;  %573 = vst [vmem:[#allocation8] sm:$0xff] %v572_v58   ;;  %612 = vst [vmem:[#allocation8 + $0x20] sm:$0xff] %v592_v59   ;;  %v393_v6 = vadd.f32 %v839_v18, %v370_v60  ;;  %v401_v7 = vadd.f32 %v839_v18, %v378_v61 }
 0x127   :  { %v371_v8 = vmul.f32 %v535_v16, %v264_v4  ;;  %v379_v9 = vmul.f32 %v535_v16, %v296_v5  ;;  %v396_v10 = vadd.f32 %v839_v18, %v373_v2  ;;  %v411_v14 = vmax.f32 %v395_v0, 0.0 }
 0x128   :  { %v404_v11 = vadd.f32 %v839_v18, %v381_v3  ;;  %v419_v15 = vmax.f32 %v403_v1, 0.0  ;;  %v409_v20 = vmax.f32 %v393_v6, 0.0  ;;  %v417_v21 = vmax.f32 %v401_v7, 0.0 }
 0x129   :  { %v394_v12 = vadd.f32 %v839_v18, %v371_v8  ;;  %v402_v13 = vadd.f32 %v839_v18, %v379_v9  ;;  %v412_v17 = vmax.f32 %v396_v10, 0.0 }
 0x12a   :  { %v420_v19 = vmax.f32 %v404_v11, 0.0 }
 0x12b   :  { %v410_v22 = vmax.f32 %v394_v12, 0.0  ;;  %v418_v23 = vmax.f32 %v402_v13, 0.0  ;;  %v587_v24 = vpack.c.bf16 %v412_v17, %v411_v14 }
 0x12c   :  { %v607_v16 = vpack.c.bf16 %v420_v19, %v419_v15 }
 0x12d   :  { %v582_v25 = vpack.c.bf16 %v410_v22, %v409_v20  ;;  %v602_v26 = vpack.c.bf16 %v418_v23, %v417_v21  ;;  %611 = vst [vmem:[#allocation8 + $0x18] sm:$0xff] %v587_v24  }
 0x12e   :  { %615 = vst [vmem:[#allocation8 + $0x38] sm:$0xff] %v607_v16  }
 0x12f   :  { %610 = vst [vmem:[#allocation8 + $0x10] sm:$0xff] %v582_v25   ;;  %614 = vst [vmem:[#allocation8 + $0x30] sm:$0xff] %v602_v26  }
 0x130   :  { %756 = shalt.err (!%p753_p6)
}
 0x131   :  { %s757_s20 = scalar_lea.hbm %s876_s4, 1024 }
 0x132   :  { %p758_p7 = scmp.ne.s32.totalorder %s876_s4, %s757_s20  ;;  %p761_p8 = scmp.lt.u32.totalorder %s757_s20, %s876_s4 }
 0x134   :  { %p763_p9 = pnand %p761_p8, %p758_p7 }
 0x136   :  { %766 = shalt.err (!%p763_p9)
}
 0x137   :  { %512 = dma.vmem_to_hbm [thread:$0]  %s507_s3, 1024, %s876_s4, [#allocation5], %s774_s25, %s774_s25, %s775_s26  }
 0x138   :  { %771 = dma.done.wait [#allocation5], 1024  }
 0x139   :  { %772 = vsyncadd [#allocation5], 4294966272 }
 0x13a   :  { %516 = vsyncpa [#allocation4], 1 }
 0x13b   :  { %517 = vsyncpa [#allocation7], 1 }
 0x13c   :  { %518 = vsyncpa [#allocation5], 1 }

</bundles_post_ra>
